<compile_context>
chip_gen: v7x
topology: tpu7x:2x2x1
jax: 0.10.0
libtpu: 0.0.40
codegen_flags: <defaults>
</compile_context>

<pallas_src>
import jax
import jax.numpy as jnp
from jax.experimental import pallas as pl
from jax.experimental.pallas import tpu as pltpu

LANE = 128


def _round_up(n: int, m: int) -> int:
    return ((n + m - 1) // m) * m


def _tpu_caps():
    """(max batch tile, vmem_limit cap) for the local TPU generation."""
    try:
        kind = jax.devices()[0].device_kind.lower()
    except Exception:
        kind = ""
    if ("v5" in kind) or ("v6" in kind):       # 128 MiB physical VMEM per core
        return 8192, 96 * 2**20
    return 4096, 56 * 2**20                    # v7x (64 MiB VMEM/TC) & unknown: conservative


# ----------------------------------------------------------------------------- kernel
def vnetwork_kernel(x_ref, w1_ref, b1_ref, w2_ref, b2_ref, w3_ref, b3_ref, o_ref):
    # Layer 1: (T, S) @ (S, H1p); operand dtype follows x, accumulation f32 (MXU).
    h1 = jnp.dot(x_ref[...], w1_ref[...], preferred_element_type=jnp.float32)
    h1 = jnp.maximum(h1 + b1_ref[...], 0.0)                       # f32 bias + ReLU (VPU)

    # Layer 2: (T, H1p) @ (H1p, H2p), bf16 operands, f32 accumulation.
    h2 = jnp.dot(h1.astype(jnp.bfloat16), w2_ref[...],
                 preferred_element_type=jnp.float32)
    h2 = jnp.maximum(h2 + b2_ref[...], 0.0)                       # f32 bias + ReLU (VPU)

    # Value head: (T, H2p) @ (H2p, 1) -> (T, 1), bf16 operands, f32 accumulation.
    out = jnp.dot(h2.astype(jnp.bfloat16), w3_ref[...],
                  preferred_element_type=jnp.float32)
    o_ref[...] = (out + b3_ref[0]).astype(o_ref.dtype)


# ----------------------------------------------------------------------------- wrapper
def vnetwork_forward(x, packed, *, tile_b=None):
    """x: (B, state_dim); packed: output of pack_vnetwork_params. Returns (B, 1) f32."""
    B, S = x.shape
    H1p = packed["w1"].shape[1]
    H2p = packed["w2"].shape[1]

    # First-layer weight follows the streaming dtype of x (bf16 x -> bf16 MXU pass).
    w1 = packed["w1"].astype(x.dtype)
    b1, w2, b2, w3, b3 = (packed[k] for k in ("b1", "w2", "b2", "w3", "b3"))

    # --- generation-aware batch tiling ----------------------------------------
    tile_cap, vmem_cap = _tpu_caps()
    if tile_b is not None:
        tile_cap = max(LANE, _round_up(int(tile_b), LANE))

    if B < 256:
        tile = _round_up(B, 8)                       # single tile spanning the padded batch
    else:
        # >= 2 grid steps so the "parallel" batch axis can use both v7x TensorCores;
        # tile capped so the big-tile win still fits every generation's VMEM.
        tile = min(tile_cap, max(LANE, _round_up(pl.cdiv(B, 2), LANE)))
    b_pad = _round_up(B, tile)
    if b_pad != B:
        x = jnp.pad(x, ((0, b_pad - B), (0, 0)))
    num_tiles = b_pad // tile

    # --- explicit VMEM budget (lane-padding aware) -----------------------------
    x_item = jnp.dtype(x.dtype).itemsize
    per_step = (
        2 * tile * LANE * x_item      # x tile (lane-padded in VMEM), double-buffered
        + 2 * tile * LANE * 4         # (tile,1) output tile (lane-padded), double-buffered
        + 5 * tile * LANE * 4         # h1/h2 f32 + bf16 staging live inside the body
    )
    resident = 2 * (
        _round_up(S, 8) * H1p * x_item        # w1
        + (H1p * H2p + H2p * LANE) * 2        # w2, w3 (bf16, w3 lane-padded)
        + 8 * (H1p + H2p) * 4                 # b1, b2 (sublane-padded)
    )
    vmem_limit = int(min(max(int(1.3 * (per_step + resident)), 32 * 2**20), vmem_cap))

    out = pl.pallas_call(
        vnetwork_kernel,
        out_shape=jax.ShapeDtypeStruct((b_pad, 1), jnp.float32),
        grid=(num_tiles,),
        in_specs=[
            pl.BlockSpec((tile, S), lambda i: (i, 0)),          # x: streamed per batch tile
            pl.BlockSpec((S, H1p), lambda i: (0, 0)),           # w1 (resident)
            pl.BlockSpec((1, H1p), lambda i: (0, 0)),           # b1
            pl.BlockSpec((H1p, H2p), lambda i: (0, 0)),         # w2 (bf16, resident)
            pl.BlockSpec((1, H2p), lambda i: (0, 0)),           # b2
            pl.BlockSpec((H2p, 1), lambda i: (0, 0)),           # w3 column (bf16)
            pl.BlockSpec(memory_space=pltpu.MemorySpace.SMEM),  # b3 scalar in SMEM
        ],
        out_specs=pl.BlockSpec((tile, 1), lambda i: (i, 0)),
        compiler_params=pltpu.CompilerParams(
            dimension_semantics=("parallel",),
            vmem_limit_bytes=vmem_limit,
        ),
    )(x, w1, b1, w2, b2, w3, b3)

    return out[:B]


# ----------------------------------------------------------------------------- params
def orthogonal(key, shape, dtype=jnp.float32):
    """Deterministic orthogonal init (gain=1), analogous to nn.init.orthogonal_."""
    rows, cols = shape
    n = max(rows, cols)
    a = jax.random.normal(key, (n, n), dtype=jnp.float32)
    q, r = jnp.linalg.qr(a)
    q = q * jnp.sign(jnp.diag(r))[None, :]
    return q[:rows, :cols].astype(dtype)


def init_vnetwork_params(state_dim, hidden_units=(64, 64), key=None):
    """Raw ('math layout') params: y = relu(x@w1+b1); relu(.@w2+b2); .@w3+b3."""
    h1, h2 = hidden_units
    key = jax.random.PRNGKey(0) if key is None else key
    k1, k2, k3 = jax.random.split(key, 3)
    return {
        "w1": orthogonal(k1, (state_dim, h1)),
        "b1": jnp.zeros((h1,), jnp.float32),
        "w2": orthogonal(k2, (h1, h2)),
        "b2": jnp.zeros((h2,), jnp.float32),
        "w3": orthogonal(k3, (h2, 1)),
        "b3": jnp.zeros((1,), jnp.float32),
    }


def pack_vnetwork_params(raw):
    """Zero-pad hidden dims to 128 lanes; w2/w3 stored bf16 (f32-accumulated on the MXU)."""
    w1, b1, w2, b2, w3, b3 = (raw[k] for k in ("w1", "b1", "w2", "b2", "w3", "b3"))
    S, H1 = w1.shape
    H2 = w2.shape[1]
    H1p, H2p = _round_up(H1, LANE), _round_up(H2, LANE)
    f32, bf16 = jnp.float32, jnp.bfloat16
    return {
        "w1": jnp.zeros((S, H1p), f32).at[:, :H1].set(w1.astype(f32)),
        "b1": jnp.zeros((1, H1p), f32).at[:, :H1].set(b1.reshape(1, H1).astype(f32)),
        "w2": jnp.zeros((H1p, H2p), bf16).at[:H1, :H2].set(w2.astype(bf16)),
        "b2": jnp.zeros((1, H2p), f32).at[:, :H2].set(b2.reshape(1, H2).astype(f32)),
        "w3": jnp.zeros((H2p, 1), bf16).at[:H2, :].set(w3.reshape(H2, 1).astype(bf16)),
        "b3": b3.reshape((1,)).astype(f32),
    }


def vnetwork_reference(x, raw, *, bf16_matmuls=False):
    """Pure-JAX reference. bf16_matmuls=True mimics the kernel's layer-2/head precision."""
    hp = jax.lax.Precision.HIGHEST

    def mm(a, b):
        if bf16_matmuls:
            return jnp.dot(a.astype(jnp.bfloat16), b.astype(jnp.bfloat16),
                           preferred_element_type=jnp.float32)
        return jnp.dot(a, b, precision=hp)

    h = jnp.maximum(jnp.dot(x, raw["w1"], precision=hp) + raw["b1"], 0.0)
    h = jnp.maximum(mm(h, raw["w2"]) + raw["b2"], 0.0)
    return mm(h, raw["w3"]) + raw["b3"]


# ----------------------------------------------------------------------------- main
if __name__ == "__main__":
    batch, state_dim = 2, 16
    key = jax.random.PRNGKey(0)
    kx, kp = jax.random.split(key)
    x = jax.random.normal(kx, (batch, state_dim), dtype=jnp.float32)

    raw = init_vnetwork_params(state_dim, hidden_units=(64, 64), key=kp)
    packed = pack_vnetwork_params(raw)

    # Small-batch path (single tile, padded batch).
    out = jax.block_until_ready(vnetwork_forward(x, packed))
    assert out.shape == (batch, 1)
    ref_bf = vnetwork_reference(x, raw, bf16_matmuls=True)
    ref_f32 = vnetwork_reference(x, raw, bf16_matmuls=False)
    assert jnp.allclose(out, ref_bf, atol=2e-2, rtol=2e-2), "mismatch vs bf16-aware reference"
    assert jnp.allclose(out, ref_f32, atol=1e-1, rtol=1e-1), "mismatch vs f32 reference"

    # Multi-tile path (B >= 256 -> >= 2 grid steps; batch not a multiple of the tile).
    x2 = jax.random.normal(jax.random.PRNGKey(1), (300, state_dim), dtype=jnp.float32)
    out2 = jax.block_until_ready(vnetwork_forward(x2, packed))
    assert out2.shape == (300, 1)
    ref2_bf = vnetwork_reference(x2, raw, bf16_matmuls=True)
    ref2_f32 = vnetwork_reference(x2, raw, bf16_matmuls=False)
    assert jnp.allclose(out2, ref2_bf, atol=2e-2, rtol=2e-2), "mismatch vs bf16-aware reference (tiled)"
    assert jnp.allclose(out2, ref2_f32, atol=1e-1, rtol=1e-1), "mismatch vs f32 reference (tiled)"

    print("KERNEL_OK")
</pallas_src>

<mosaic_0001>
module attributes {stable_mosaic.version = 11 : i64} {
  func.func @vnetwork_kernel(%arg0: i32, %arg1: memref<8x16xf32, #tpu.memory_space<vmem>>, %arg2: memref<16x128xf32, #tpu.memory_space<vmem>>, %arg3: memref<1x128xf32, #tpu.memory_space<vmem>>, %arg4: memref<128x128xbf16, #tpu.memory_space<vmem>>, %arg5: memref<1x128xf32, #tpu.memory_space<vmem>>, %arg6: memref<128x1xbf16, #tpu.memory_space<vmem>>, %arg7: memref<1xf32, #tpu.memory_space<smem>>, %arg8: memref<8x1xf32, #tpu.memory_space<vmem>>) attributes {dimension_semantics = [#tpu.dimension_semantics<parallel>], iteration_bounds = array<i64: 1>, scalar_prefetch = 0 : i64, scratch_operands = 0 : i64, tpu.core_type = #tpu.core_type<tc>, window_params = [{transform_indices = @transform_0, window_bounds = array<i64: 8, 16>}, {pipeline_mode = #tpu.pipeline_mode<synchronous>, transform_indices = @transform_1, window_bounds = array<i64: 16, 128>}, {pipeline_mode = #tpu.pipeline_mode<synchronous>, transform_indices = @transform_2, window_bounds = array<i64: 1, 128>}, {pipeline_mode = #tpu.pipeline_mode<synchronous>, transform_indices = @transform_3, window_bounds = array<i64: 128, 128>}, {pipeline_mode = #tpu.pipeline_mode<synchronous>, transform_indices = @transform_4, window_bounds = array<i64: 1, 128>}, {pipeline_mode = #tpu.pipeline_mode<synchronous>, transform_indices = @transform_5, window_bounds = array<i64: 128, 1>}, {transform_indices = @transform_6, window_bounds = array<i64: 1>}, {transform_indices = @transform_7, window_bounds = array<i64: 8, 1>}]} {
    %c0 = arith.constant 0 : index
    %c0_0 = arith.constant 0 : index
    %0 = vector.load %arg1[%c0, %c0_0] : memref<8x16xf32, #tpu.memory_space<vmem>>, vector<8x16xf32>
    %c0_1 = arith.constant 0 : index
    %c0_2 = arith.constant 0 : index
    %1 = vector.load %arg2[%c0_1, %c0_2] : memref<16x128xf32, #tpu.memory_space<vmem>>, vector<16x128xf32>
    %cst = arith.constant dense<0.000000e+00> : vector<8x128xf32>
    %2 = tpu.matmul %0, %1, %cst {dimension_numbers = #tpu.dot_dimension_numbers<[1], [0], [0], [1], [0, 0, 1, 1], [], []>} : vector<8x16xf32>, vector<16x128xf32>, vector<8x128xf32> -> vector<8x128xf32>
    %c0_3 = arith.constant 0 : index
    %c0_4 = arith.constant 0 : index
    %3 = vector.load %arg3[%c0_3, %c0_4] : memref<1x128xf32, #tpu.memory_space<vmem>>, vector<1x128xf32>
    %4 = vector.broadcast %3 : vector<1x128xf32> to vector<8x128xf32>
    %5 = arith.addf %2, %4 : vector<8x128xf32>
    %cst_5 = arith.constant 0.000000e+00 : f32
    %6 = vector.broadcast %cst_5 : f32 to vector<8x128xf32>
    %7 = arith.maximumf %5, %6 : vector<8x128xf32>
    %8 = arith.truncf %7 : vector<8x128xf32> to vector<8x128xbf16>
    %c0_6 = arith.constant 0 : index
    %c0_7 = arith.constant 0 : index
    %9 = vector.load %arg4[%c0_6, %c0_7] : memref<128x128xbf16, #tpu.memory_space<vmem>>, vector<128x128xbf16>
    %cst_8 = arith.constant dense<0.000000e+00> : vector<8x128xf32>
    %10 = tpu.matmul %8, %9, %cst_8 {dimension_numbers = #tpu.dot_dimension_numbers<[1], [0], [0], [1], [0, 0, 1, 1], [], []>} : vector<8x128xbf16>, vector<128x128xbf16>, vector<8x128xf32> -> vector<8x128xf32>
    %c0_9 = arith.constant 0 : index
    %c0_10 = arith.constant 0 : index
    %11 = vector.load %arg5[%c0_9, %c0_10] : memref<1x128xf32, #tpu.memory_space<vmem>>, vector<1x128xf32>
    %12 = vector.broadcast %11 : vector<1x128xf32> to vector<8x128xf32>
    %13 = arith.addf %10, %12 : vector<8x128xf32>
    %cst_11 = arith.constant 0.000000e+00 : f32
    %14 = vector.broadcast %cst_11 : f32 to vector<8x128xf32>
    %15 = arith.maximumf %13, %14 : vector<8x128xf32>
    %16 = arith.truncf %15 : vector<8x128xf32> to vector<8x128xbf16>
    %c0_12 = arith.constant 0 : index
    %c0_13 = arith.constant 0 : index
    %17 = vector.load %arg6[%c0_12, %c0_13] : memref<128x1xbf16, #tpu.memory_space<vmem>>, vector<128x1xbf16>
    %cst_14 = arith.constant dense<0.000000e+00> : vector<8x1xf32>
    %18 = tpu.matmul %16, %17, %cst_14 {dimension_numbers = #tpu.dot_dimension_numbers<[1], [0], [0], [1], [0, 0, 1, 1], [], []>} : vector<8x128xbf16>, vector<128x1xbf16>, vector<8x1xf32> -> vector<8x1xf32>
    %c0_15 = arith.constant 0 : index
    %19 = memref.load %arg7[%c0_15] : memref<1xf32, #tpu.memory_space<smem>>
    %20 = vector.broadcast %19 : f32 to vector<8x1xf32>
    %21 = arith.addf %18, %20 : vector<8x1xf32>
    %c0_16 = arith.constant 0 : index
    %c0_17 = arith.constant 0 : index
    %22 = vector.load %arg8[%c0_16, %c0_17] : memref<8x1xf32, #tpu.memory_space<vmem>>, vector<8x1xf32>
    tpu.vector_store %arg8[%c0_16, %c0_17], %21 {strides = array<i32>} : memref<8x1xf32, #tpu.memory_space<vmem>>, vector<8x1xf32>,
    return
  }
  func.func @transform_0(%arg0: i32) -> (i32, i32) {
    %c0_i32 = arith.constant 0 : i32
    %c0_i32_0 = arith.constant 0 : i32
    return %arg0, %c0_i32 : i32, i32
  }
  func.func @transform_1(%arg0: i32) -> (i32, i32) {
    %c0_i32 = arith.constant 0 : i32
    %c0_i32_0 = arith.constant 0 : i32
    %c0_i32_1 = arith.constant 0 : i32
    return %c0_i32, %c0_i32_0 : i32, i32
  }
  func.func @transform_2(%arg0: i32) -> (i32, i32) {
    %c0_i32 = arith.constant 0 : i32
    %c0_i32_0 = arith.constant 0 : i32
    %c0_i32_1 = arith.constant 0 : i32
    return %c0_i32, %c0_i32_0 : i32, i32
  }
  func.func @transform_3(%arg0: i32) -> (i32, i32) {
    %c0_i32 = arith.constant 0 : i32
    %c0_i32_0 = arith.constant 0 : i32
    %c0_i32_1 = arith.constant 0 : i32
    return %c0_i32, %c0_i32_0 : i32, i32
  }
  func.func @transform_4(%arg0: i32) -> (i32, i32) {
    %c0_i32 = arith.constant 0 : i32
    %c0_i32_0 = arith.constant 0 : i32
    %c0_i32_1 = arith.constant 0 : i32
    return %c0_i32, %c0_i32_0 : i32, i32
  }
  func.func @transform_5(%arg0: i32) -> (i32, i32) {
    %c0_i32 = arith.constant 0 : i32
    %c0_i32_0 = arith.constant 0 : i32
    %c0_i32_1 = arith.constant 0 : i32
    return %c0_i32, %c0_i32_0 : i32, i32
  }
  func.func @transform_6(%arg0: i32) -> i32 {
    %c0_i32 = arith.constant 0 : i32
    %c0_i32_0 = arith.constant 0 : i32
    return %c0_i32 : i32
  }
  func.func @transform_7(%arg0: i32) -> (i32, i32) {
    %c0_i32 = arith.constant 0 : i32
    %c0_i32_0 = arith.constant 0 : i32
    return %arg0, %c0_i32 : i32, i32
  }
}

</mosaic_0001>

<bundles_post_ra>
// kernel: tpu_custom_call.1
= control target key start
LH: loop header
LB: loop body
LE: loop exit
PB: predicated region body
PF: predicated region fallthrough
CT: control target
= control target key end

     0   :  { %13 = vsyncpa [#allocation4], 0  ;;  %s659_s0 = inlined_call_operand.hbm [shape: f32[8,16], index: 0, kind: input, shape index: {}]   ;;  %s660_s1 = inlined_call_operand.vmem [shape: f32[16,128], index: 1, kind: input, shape index: {}]   ;;  %s661_s2 = inlined_call_operand.hbm [shape: f32[1,128], index: 2, kind: input, shape index: {}]   ;;  %s662_s3 = inlined_call_operand.vmem [shape: bf16[128,128], index: 3, kind: input, shape index: {}]   ;;  %s663_s4 = inlined_call_operand.vmem [shape: f32[1,128], index: 4, kind: input, shape index: {}]   ;;  %s664_s5 = inlined_call_operand.vmem [shape: bf16[128,1], index: 5, kind: input, shape index: {}]   ;;  %s665_s6 = inlined_call_operand.<no memory space> [shape: f32[1], index: 6, kind: input, shape index: {}]   ;;  %s666_s7 = inlined_call_operand.vmem [shape: f32[8,1], index: 7, kind: output, shape index: {}]  }
   0x1   :  { %14 = vsyncpa [#allocation6], 0  ;;  %s524_s24 = smov [#allocation3]   ;;  %s525_s26 = smov [#allocation5]  }
   0x2   :  { %s21_s25 = sshll.u32 %s524_s24, 4  ;;  %s33_s27 = sshll.u32 %s525_s26, 4  ;;  %s22_s25 = int_to_ptr.vmem [resolvable:$true] %s21_s25  ;;  %s34_s27 = int_to_ptr.vmem [resolvable:$true] %s33_s27 }
   0x3   :  { %s476_s30 = scalar_lea.hbm %s659_s0, 128 }
   0x4   :  { %p477_p0 = scmp.ne.s32.totalorder %s659_s0, %s476_s30  ;;  %p480_p1 = scmp.lt.u32.totalorder %s476_s30, %s659_s0 }
   0x6   :  { %p482_p2 = pnand %p480_p1, %p477_p0 }
   0x8   :  { %485 = shalt.err (!%p482_p2)
}
   0x9   :  { %s486_s12 = scalar_lea.vmem %s22_s25, 128  ;;  %p491_p4 = scmp.lt.s32.totalorder %s22_s25, %s22_s25 }
   0xa   :  { %p487_p3 = scmp.ne.s32.totalorder %s22_s25, %s486_s12  ;;  %p492_p5 = scmp.lt.s32.totalorder %s486_s12, %s486_s12 }
   0xc   :  { %p493_p6 = por %p492_p5, %p491_p4 }
   0xe   :  { %p494_p7 = pnand %p493_p6, %p487_p3 }
  0x10   :  { %497 = shalt.err (!%p494_p7)
}
  0x11   :  { %24 = dma.hbm_to_vmem [thread:$0]  %s659_s0, 128, %s22_s25, [#allocation4]  }
  0x12   :  { %s498_s17 = scalar_lea.hbm %s661_s2, 16 }
  0x13   :  { %p499_p8 = scmp.ne.s32.totalorder %s661_s2, %s498_s17  ;;  %p502_p9 = scmp.lt.u32.totalorder %s498_s17, %s661_s2 }
  0x15   :  { %p504_p10 = pnand %p502_p9, %p499_p8 }
  0x17   :  { %507 = shalt.err (!%p504_p10)
}
  0x18   :  { %s508_s22 = scalar_lea.vmem %s34_s27, 16  ;;  %s512_s23 = scalar_lea.vmem %s34_s27, 32 }
  0x19   :  { %p509_p11 = scmp.ne.s32.totalorder %s34_s27, %s508_s22  ;;  %p513_p12 = scmp.lt.s32.totalorder %s34_s27, %s34_s27 }
  0x1a   :  { %p514_p13 = scmp.lt.s32.totalorder %s512_s23, %s508_s22 }
  0x1c   :  { %p515_p0 = por %p514_p13, %p513_p12 }
  0x1e   :  { %p516_p1 = pnand %p515_p0, %p509_p11 }
  0x20   :  { %519 = shalt.err (!%p516_p1)
}
  0x21   :  { %36 = dma.hbm_to_vmem [thread:$0]  %s661_s2, 16, %s34_s27, [#allocation6]  }
  0x22   :  { %520 = dma.done.wait [#allocation4], 128  }
  0x23   :  { %521 = vsyncadd [#allocation4], 4294967168 }
  0x24   :  { %522 = dma.done.wait [#allocation6], 16  }
  0x25   :  { %523 = vsyncadd [#allocation6], 4294967280  ;;  %v526_v0 = vmov 0.0|0.0   ;;  %vm527_vm0 = vmmov 0   ;;  %v528_v1 = vmov 0.0   ;;  %v53_v2 = vld [vmem:[%s660_s1] sm:$0xff]  ;;  %v268_v36 = vstv %s665_s6 }
  0x26   :  { %452 = vmatprep.subr.bf16.mxu0 %v526_v0  ;;  %409 = vmatprep.mubr.msk.f32.mxu0 %vm527_vm0, %v528_v1  ;;  %v54_v3 = vld [vmem:[%s660_s1 + $0x8] sm:$0xff]  ;;  %v460_v5 = vld [vmem:[%s662_s3] sm:$0xff]   ;;  %vm62_vm1 = vcmask 130048   ;;  %v462_v8 = vld [vmem:[%s662_s3 + $0x10] sm:$0xff]   ;;  %vm357_vm2 = vcmask 7168  }
  0x27   :  { %412 = vmatprep.subr.bf16.mxu1 %v528_v1  ;;  %428 = vmatprep.mubr.msk.bf16.mxu1 %vm527_vm0, %v528_v1  ;;  %v453_v4 = vpack.c.bf16 %v54_v3, %v53_v2  ;;  %v52_v6 = vld [vmem:[#allocation3] sm:$0xff]  ;;  %v461_v7 = vld [vmem:[%s662_s3 + $0x8] sm:$0xff]   ;;  %v463_v9 = vld [vmem:[%s662_s3 + $0x18] sm:$0xff]  }
  0x28   :  { %413 = vmatpush3.bf16.msra.mxu1 %v460_v5  ;;  %v464_v10 = vld [vmem:[%s662_s3 + $0x20] sm:$0xff]   ;;  %v465_v11 = vld [vmem:[%s662_s3 + $0x28] sm:$0xff]   ;;  %v466_v12 = vld [vmem:[%s662_s3 + $0x30] sm:$0xff]  }
  0x29   :  { %454 = vmatpush3.bf16.msra.mxu0 %v453_v4  ;;  %414 = vmatprep.subr.bf16.mxu1 %v528_v1  ;;  %v467_v13 = vld [vmem:[%s662_s3 + $0x38] sm:$0xff]   ;;  %v468_v14 = vld [vmem:[%s664_s5] sm:$0xff]   ;;  %v469_v15 = vld [vmem:[%s664_s5 + $0x8] sm:$0xff]  }
  0x2a   :  { %432 = vmatprep.subr.bf16.mxu0 %v528_v1  ;;  %v470_v16 = vld [vmem:[%s664_s5 + $0x10] sm:$0xff]   ;;  %v471_v17 = vld [vmem:[%s664_s5 + $0x18] sm:$0xff]   ;;  %v472_v18 = vld [vmem:[%s664_s5 + $0x20] sm:$0xff]  }
  0x2b   :  { %v473_v19 = vld [vmem:[%s664_s5 + $0x28] sm:$0xff]   ;;  %v474_v26 = vld [vmem:[%s664_s5 + $0x30] sm:$0xff]   ;;  %v475_v27 = vld [vmem:[%s664_s5 + $0x38] sm:$0xff]  }
  0x2c   :  { %410 = vmatmul.mubr.msk.f32.vlgmr.msra.gmra.mrb[0].mxu0 %vm62_vm1, %v52_v6  ;;  %415 = vmatpush3.bf16.msra.mxu1 %v461_v7  ;;  %v365_v20 = vld [vmem:[#allocation5] ss:$0 sm:$0xff]  ;;  %v367_v28 = vld [vmem:[%s663_s4] ss:$0 sm:$0xff] }
  0x2d   :  { %448 = vmatprep.mubr.msk.bf16.mxu0 %vm527_vm0, %v528_v1  ;;  %416 = vmatprep.subr.bf16.mxu1 %v528_v1 }
  0x2e   :  { %433 = vmatpush3.bf16.msra.mxu0 %v468_v14 }
  0x2f   :  { %434 = vmatprep.subr.bf16.mxu0 %v528_v1 }
  0x30   :  { %417 = vmatpush3.bf16.msra.mxu1 %v462_v8 }
  0x31   :  { %418 = vmatprep.subr.bf16.mxu1 %v528_v1 }
  0x32   :  { %435 = vmatpush3.bf16.msra.mxu0 %v469_v15 }
  0x33   :  { %436 = vmatprep.subr.bf16.mxu0 %v528_v1 }
  0x34   :  { %419 = vmatpush3.bf16.msra.mxu1 %v463_v9 }
  0x35   :  { %420 = vmatprep.subr.bf16.mxu1 %v528_v1 }
  0x36   :  { %437 = vmatpush3.bf16.msra.mxu0 %v470_v16 }
  0x37   :  { %438 = vmatprep.subr.bf16.mxu0 %v528_v1 }
  0x38   :  { %421 = vmatpush3.bf16.msra.mxu1 %v464_v10 }
  0x39   :  { %422 = vmatprep.subr.bf16.mxu1 %v528_v1 }
  0x3a   :  { %439 = vmatpush3.bf16.msra.mxu0 %v471_v17 }
  0x3b   :  { %440 = vmatprep.subr.bf16.mxu0 %v528_v1 }
  0x3c   :  { %423 = vmatpush3.bf16.msra.mxu1 %v465_v11 }
  0x3d   :  { %424 = vmatprep.subr.bf16.mxu1 %v528_v1 }
  0x3e   :  { %441 = vmatpush3.bf16.msra.mxu0 %v472_v18 }
  0x3f   :  { %442 = vmatprep.subr.bf16.mxu0 %v528_v1 }
  0x40   :  { %425 = vmatpush3.bf16.msra.mxu1 %v466_v12 }
  0x41   :  { %426 = vmatprep.subr.bf16.mxu1 %v528_v1 }
  0x42   :  { %443 = vmatpush3.bf16.msra.mxu0 %v473_v19 }
  0x43   :  { %444 = vmatprep.subr.bf16.mxu0 %v528_v1 }
  0x44   :  { %427 = vmatpush3.bf16.msra.mxu1 %v467_v13 }
  0x46   :  { %445 = vmatpush3.bf16.msra.mxu0 %v474_v26 }
  0x47   :  { %446 = vmatprep.subr.bf16.mxu0 %v528_v1 }
  0x4a   :  { %447 = vmatpush3.bf16.msra.mxu0 %v475_v27 }
  0xff   :  { %v132_v21 = vpop.f32.mrb[0].mxu0 }
 0x100   :  { %v133_v22 = vadd.f32 %v365_v20, %v132_v21  ;;  %v411_v23 = vpop.f32.mrb[1].mxu0 }
 0x102   :  { %v136_v24 = vmax.f32 %v133_v22, 0.0 }
 0x104   :  { %v137_v25 = vpack.c.bf16 %v136_v24, %v136_v24 }
 0x106   :  { %429 = vmatmul.mubr.bf16.vlgmr.msra.gmra.mrb[0].mxu1 %v137_v25 }
 0x1d9   :  { %v243_v29 = vpop.f32.mrb[0].mxu1 }
 0x1da   :  { %v244_v30 = vadd.f32 %v367_v28, %v243_v29  ;;  %v430_v31 = vpop.f32.mrb[1].mxu1 }
 0x1db   :  { %v246_v32 = vpop.f32.mrb[2].mxu1 }
 0x1dc   :  { %v249_v33 = vmax.f32 %v244_v30, 0.0  ;;  %v431_v34 = vpop.f32.mrb[3].mxu1 }
 0x1de   :  { %v250_v35 = vpack.c.bf16 %v249_v33, %v249_v33 }
 0x1e0   :  { %449 = vmatmul.mubr.bf16.vlgmr.msra.gmra.mrb[4].mxu0 %v250_v35 }
 0x2b3   :  { %v351_v37 = vpop.f32.mrb[4].mxu0 }
 0x2b4   :  { %v352_v38 = vadd.f32 %v351_v37, %v268_v36  ;;  %v450_v39 = vpop.f32.mrb[5].mxu0 }
 0x2b5   :  { %v354_v40 = vpop.f32.mrb[6].mxu0 }
 0x2b6   :  { %358 = vst.msk [vmem:[%s666_s7] sm:$0xff] %vm357_vm2, %v352_v38  ;;  %v451_v41 = vpop.f32.mrb[7].mxu0 }
 0x2b7   :  { %363 = vsyncpa [#allocation4], 1 }
 0x2b8   :  { %364 = vsyncpa [#allocation6], 1 }

</bundles_post_ra>
